<compile_context>
chip_gen: v5e
topology: v5e:2x2
jax: 0.10.0
libtpu: 0.0.40
codegen_flags: <defaults>
</compile_context>

<pallas_src>
import functools

import jax
import jax.numpy as jnp
from jax.experimental import pallas as pl
from jax.experimental.pallas import tpu as pltpu


_SQRT_2_OVER_PI = 0.7978845608028654


def _gelu_tanh(x):
    # PyTorch "gelu_pytorch_tanh": 0.5*x*(1 + tanh(sqrt(2/pi)*(x + 0.044715*x^3)))
    return 0.5 * x * (1.0 + jnp.tanh(_SQRT_2_OVER_PI * (x + 0.044715 * x * x * x)))


def _round_up(x, m):
    return (x + m - 1) // m * m


# ---------------------------------------------------------------------------
# Kernel
# ---------------------------------------------------------------------------
def _gemma3_mlp_kernel(x_ref, wgu_ref, wd_ref, o_ref, acc_ref, *, tn):
    """One (M-tile, I-tile) grid step.

    x_ref:   [tm, H]      activation tile (constant across the I reduction)
    wgu_ref: [H, 2*tn]    packed [gate | up] weight slice for reduction step j
    wd_ref:  [tn, H]      down_proj weight slice for reduction step j
    o_ref:   [tm, H]      output tile (written once, at the last reduction step)
    acc_ref: [tm, H] f32  resident VMEM accumulator
    """
    j = pl.program_id(1)

    x = x_ref[...]
    # Single fused MXU matmul for gate+up (one weight DMA stream per step).
    gu = jnp.dot(x, wgu_ref[...], preferred_element_type=jnp.float32)
    gate = gu[:, :tn]
    up = gu[:, tn:]
    hidden = _gelu_tanh(gate) * up                       # tanh -> EUP slot
    # Downcast to the weight dtype for the down projection (bf16 in prod);
    # accumulate the down projection in f32.
    partial = jnp.dot(hidden.astype(wd_ref.dtype), wd_ref[...],
                      preferred_element_type=jnp.float32)

    @pl.when(j == 0)
    def _():
        acc_ref[...] = partial          # first step: store, skip zero-init pass

    @pl.when(j > 0)
    def _():
        acc_ref[...] += partial

    @pl.when(j == pl.num_programs(1) - 1)
    def _():
        o_ref[...] = acc_ref[...].astype(o_ref.dtype)


# ---------------------------------------------------------------------------
# Tile selection (generation-aware) and VMEM budgeting
# ---------------------------------------------------------------------------
_TM_CANDIDATES = (768, 512, 384, 256, 128, 64, 32, 16, 8)
_TN_CANDIDATES = (512, 256, 128)


def _clamp_tm(tm, m):
    # Either the full M extent (always a legal block dim) or a multiple of 8.
    if tm >= m:
        return m
    return max(8, (tm // 8) * 8)


def _clamp_tn(tn, i_dim):
    # tn must be a multiple of 128 (lane width); never larger than padded I.
    i_pad_min = _round_up(i_dim, 128)
    tn = _round_up(max(tn, 128), 128)
    return min(tn, i_pad_min)


def _vmem_tile_bytes(tm, tn, h, x_itemsize, w_itemsize):
    """Conservative per-step VMEM footprint (incl. double buffers & temps)."""
    x_tiles = 2 * tm * h * x_itemsize              # activation blocks (2 bufs)
    wgu_tiles = 2 * h * (2 * tn) * w_itemsize      # packed gate|up slices (2 bufs)
    wd_tiles = 2 * tn * h * w_itemsize             # down-proj slices (2 bufs)
    out_tiles = 2 * tm * h * x_itemsize            # output blocks (2 bufs)
    acc = tm * h * 4                               # resident f32 accumulator
    temps = 6 * tm * tn * 4 + tm * h * 4           # gu/gate/up/hidden + partial
    return x_tiles + wgu_tiles + wd_tiles + out_tiles + acc + temps


def _vmem_info():
    """Return (vmem_limit_bytes, per-step tile budget) for the actual chip."""
    try:
        cap = int(pltpu.get_tpu_info().vmem_capacity_bytes)
    except Exception:
        # Query can fail under AOT / CPU tracing: assume the smallest
        # generation (v7x, 64 MiB) so chosen tiles are valid everywhere.
        cap = 64 << 20
    limit = max(cap - (16 << 20), 32 << 20)        # leave compiler headroom
    budget = int(limit * 0.9)
    return limit, budget


def _select_tiles(m, h, i_dim, x_itemsize, w_itemsize, budget, tm=None, tn=None):
    tm_cands = ((_clamp_tm(tm, m),) if tm is not None else
                tuple(dict.fromkeys(_clamp_tm(t, m) for t in _TM_CANDIDATES)))
    tn_cands = ((_clamp_tn(tn, i_dim),) if tn is not None else
                tuple(dict.fromkeys(_clamp_tn(t, i_dim) for t in _TN_CANDIDATES)))
    # Prefer the largest M tile (arithmetic intensity), then the largest I tile.
    for tm_c in tm_cands:
        for tn_c in tn_cands:
            if _vmem_tile_bytes(tm_c, tn_c, h, x_itemsize, w_itemsize) <= budget:
                return tm_c, tn_c
    return tm_cands[-1], tn_cands[-1]              # tiny shapes: smallest tiles


# ---------------------------------------------------------------------------
# Weight packing (in production this is done once at weight-load time)
# ---------------------------------------------------------------------------
def pack_gemma3_mlp_weights(w_gate_t, w_up_t, w_down_t, tn):
    """Pad I to a multiple of tn (zero cols/rows are inert) and interleave the
    gate/up weights per reduction block into one [H, 2*I_pad] operand so each
    grid step issues a single gate+up weight DMA and one wide MXU matmul."""
    h, i_dim = w_gate_t.shape
    i_pad = _round_up(i_dim, tn)
    if i_pad != i_dim:
        w_gate_t = jnp.pad(w_gate_t, ((0, 0), (0, i_pad - i_dim)))
        w_up_t = jnp.pad(w_up_t, ((0, 0), (0, i_pad - i_dim)))
        w_down_t = jnp.pad(w_down_t, ((0, i_pad - i_dim), (0, 0)))
    nb = i_pad // tn
    wgu = jnp.concatenate(
        [w_gate_t.reshape(h, nb, tn), w_up_t.reshape(h, nb, tn)], axis=-1
    ).reshape(h, 2 * i_pad)
    return wgu, w_down_t, i_pad


# ---------------------------------------------------------------------------
# Wrapper
# ---------------------------------------------------------------------------
def gemma3_mlp(x, w_gate_t, w_up_t, w_down_t, *, tm=None, tn=None):
    """Gemma3 MLP forward.

    x:        [B, S, H]
    w_gate_t: [H, I]   (transposed PyTorch gate_proj.weight)
    w_up_t:   [H, I]   (transposed PyTorch up_proj.weight)
    w_down_t: [I, H]   (transposed PyTorch down_proj.weight)
    tm / tn:  optional tile overrides; by default chosen per TPU generation.
    """
    B, S, H = x.shape
    Hw, I = w_gate_t.shape
    assert Hw == H and w_up_t.shape == (H, I) and w_down_t.shape == (I, H)
    M = B * S

    x_itemsize = jnp.dtype(x.dtype).itemsize
    w_itemsize = jnp.dtype(w_gate_t.dtype).itemsize

    vmem_limit, budget = _vmem_info()
    tm_eff, tn_eff = _select_tiles(M, H, I, x_itemsize, w_itemsize, budget, tm, tn)

    wgu, wd, I_pad = pack_gemma3_mlp_weights(w_gate_t, w_up_t, w_down_t, tn_eff)

    grid = (pl.cdiv(M, tm_eff), I_pad // tn_eff)
    x2 = x.reshape(M, H)            # metadata only; no host-side padding of x

    cost = pl.CostEstimate(
        flops=6 * M * H * I_pad,
        transcendentals=M * I_pad,
        bytes_accessed=(2 * M * H * x_itemsize
                        + grid[0] * 3 * H * I_pad * w_itemsize),
    )

    out = pl.pallas_call(
        functools.partial(_gemma3_mlp_kernel, tn=tn_eff),
        out_shape=jax.ShapeDtypeStruct((M, H), x.dtype),
        grid_spec=pltpu.PrefetchScalarGridSpec(
            num_scalar_prefetch=0,
            grid=grid,
            in_specs=[
                pl.BlockSpec((tm_eff, H), lambda i, j: (i, 0)),        # x tile
                pl.BlockSpec((H, 2 * tn_eff), lambda i, j: (0, j)),    # gate|up
                pl.BlockSpec((tn_eff, H), lambda i, j: (j, 0)),        # down
            ],
            out_specs=pl.BlockSpec((tm_eff, H), lambda i, j: (i, 0)),
            scratch_shapes=[pltpu.VMEM((tm_eff, H), jnp.float32)],
        ),
        compiler_params=pltpu.CompilerParams(
            dimension_semantics=("parallel", "arbitrary"),
            vmem_limit_bytes=vmem_limit,
        ),
        cost_estimate=cost,
    )(x2, wgu, wd)

    return out.reshape(B, S, H)


def reference_mlp(x, w_gate_t, w_up_t, w_down_t):
    gate = jnp.einsum("bsh,hi->bsi", x, w_gate_t)
    up = jnp.einsum("bsh,hi->bsi", x, w_up_t)
    return jnp.einsum("bsi,ih->bsh", _gelu_tanh(gate) * up, w_down_t)


if __name__ == "__main__":
    key = jax.random.PRNGKey(0)

    # --- Test 1: Gemma3-like small config. M=144 is not a multiple of the M
    # tile (exercises the ragged last block, no host-side pad) and tn=128 gives
    # a 4-step I reduction (exercises the accumulator path).
    B, S, H, I = 2, 72, 256, 512
    kx, kg, ku, kd = jax.random.split(key, 4)
    x = jax.random.normal(kx, (B, S, H), dtype=jnp.float32)
    # PyTorch Linear weights are [out, in]; store transposed [in, out].
    w_gate_t = (jax.random.normal(kg, (I, H), dtype=jnp.float32) * 0.05).T
    w_up_t = (jax.random.normal(ku, (I, H), dtype=jnp.float32) * 0.05).T
    w_down_t = (jax.random.normal(kd, (H, I), dtype=jnp.float32) * 0.05).T

    ref = reference_mlp(x, w_gate_t, w_up_t, w_down_t)

    out = gemma3_mlp(x, w_gate_t, w_up_t, w_down_t, tm=64, tn=128)
    out = jax.block_until_ready(out)
    assert out.shape == (B, S, H)
    # Tolerance accounts for the TPU default (bf16-pass) f32 matmul precision.
    assert jnp.allclose(out, ref, atol=1e-2, rtol=2e-2), "tiled path mismatch"

    # Auto (generation-aware) tile selection path.
    out_auto = jax.block_until_ready(gemma3_mlp(x, w_gate_t, w_up_t, w_down_t))
    assert jnp.allclose(out_auto, ref, atol=1e-2, rtol=2e-2), "auto path mismatch"

    # --- Test 2: intermediate size NOT a multiple of 128 (exercises zero
    # padding of I inside pack_gemma3_mlp_weights) plus a ragged M block.
    B2, S2, H2, I2 = 1, 40, 256, 320
    k2 = jax.random.split(key, 8)
    x2 = jax.random.normal(k2[4], (B2, S2, H2), dtype=jnp.float32)
    wg2 = (jax.random.normal(k2[5], (I2, H2), dtype=jnp.float32) * 0.05).T
    wu2 = (jax.random.normal(k2[6], (I2, H2), dtype=jnp.float32) * 0.05).T
    wd2 = (jax.random.normal(k2[7], (H2, I2), dtype=jnp.float32) * 0.05).T
    out2 = jax.block_until_ready(gemma3_mlp(x2, wg2, wu2, wd2, tm=32, tn=128))
    ref2 = reference_mlp(x2, wg2, wu2, wd2)
    assert out2.shape == (B2, S2, H2)
    assert jnp.allclose(out2, ref2, atol=1e-2, rtol=2e-2), "padded-I mismatch"

    # --- Test 3: bf16 weights/activations (production dtype). The in-kernel
    # downcast of gelu(gate)*up to bf16 before down_proj is intentional, so
    # only check shape / finiteness here.
    out_bf16 = gemma3_mlp(
        x.astype(jnp.bfloat16), w_gate_t.astype(jnp.bfloat16),
        w_up_t.astype(jnp.bfloat16), w_down_t.astype(jnp.bfloat16),
        tm=64, tn=128)
    out_bf16 = jax.block_until_ready(out_bf16)
    assert out_bf16.shape == (B, S, H)
    assert bool(jnp.all(jnp.isfinite(out_bf16.astype(jnp.float32))))

    print("KERNEL_OK")
</pallas_src>

<mosaic_0001>
module attributes {stable_mosaic.version = 11 : i64} {
  func.func @_gemma3_mlp_kernel(%arg0: i32, %arg1: i32, %arg2: memref<64x256xf32, #tpu.memory_space<vmem>>, %arg3: memref<256x256xf32, #tpu.memory_space<vmem>>, %arg4: memref<128x256xf32, #tpu.memory_space<vmem>>, %arg5: memref<64x256xf32, #tpu.memory_space<vmem>>, %arg6: memref<64x256xf32, #tpu.memory_space<vmem>>) attributes {dimension_semantics = [#tpu.dimension_semantics<parallel>, #tpu.dimension_semantics<arbitrary>], iteration_bounds = array<i64: 3, 4>, scalar_prefetch = 0 : i64, scratch_operands = 1 : i64, tpu.core_type = #tpu.core_type<tc>, window_params = [{transform_indices = @transform_0, window_bounds = array<i64: 64, 256>}, {transform_indices = @transform_1, window_bounds = array<i64: 256, 256>}, {transform_indices = @transform_2, window_bounds = array<i64: 128, 256>}, {transform_indices = @transform_3, window_bounds = array<i64: 64, 256>}]} {
    %c0 = arith.constant 0 : index
    %c0_0 = arith.constant 0 : index
    %0 = vector.load %arg2[%c0, %c0_0] : memref<64x256xf32, #tpu.memory_space<vmem>>, vector<64x256xf32>
    %c0_1 = arith.constant 0 : index
    %c0_2 = arith.constant 0 : index
    %1 = vector.load %arg3[%c0_1, %c0_2] : memref<256x256xf32, #tpu.memory_space<vmem>>, vector<256x256xf32>
    %cst = arith.constant dense<0.000000e+00> : vector<64x256xf32>
    %2 = tpu.matmul %0, %1, %cst {dimension_numbers = #tpu.dot_dimension_numbers<[1], [0], [0], [1], [0, 0, 1, 1], [], []>} : vector<64x256xf32>, vector<256x256xf32>, vector<64x256xf32> -> vector<64x256xf32>
    %3 = vector.extract_strided_slice %2 {offsets = [0, 0], sizes = [64, 128], strides = [1, 1]} : vector<64x256xf32> to vector<64x128xf32>
    %4 = vector.extract_strided_slice %2 {offsets = [0, 128], sizes = [64, 128], strides = [1, 1]} : vector<64x256xf32> to vector<64x128xf32>
    %cst_3 = arith.constant 5.000000e-01 : f32
    %5 = vector.broadcast %cst_3 : f32 to vector<64x128xf32>
    %6 = arith.mulf %5, %3 : vector<64x128xf32>
    %cst_4 = arith.constant 4.471500e-02 : f32
    %7 = vector.broadcast %cst_4 : f32 to vector<64x128xf32>
    %8 = arith.mulf %7, %3 : vector<64x128xf32>
    %9 = arith.mulf %8, %3 : vector<64x128xf32>
    %10 = arith.mulf %9, %3 : vector<64x128xf32>
    %11 = arith.addf %3, %10 : vector<64x128xf32>
    %cst_5 = arith.constant 0.797884583 : f32
    %12 = vector.broadcast %cst_5 : f32 to vector<64x128xf32>
    %13 = arith.mulf %12, %11 : vector<64x128xf32>
    %14 = math.tanh %13 : vector<64x128xf32>
    %cst_6 = arith.constant 1.000000e+00 : f32
    %15 = vector.broadcast %cst_6 : f32 to vector<64x128xf32>
    %16 = arith.addf %15, %14 : vector<64x128xf32>
    %17 = arith.mulf %6, %16 : vector<64x128xf32>
    %18 = arith.mulf %17, %4 : vector<64x128xf32>
    %c0_7 = arith.constant 0 : index
    %c0_8 = arith.constant 0 : index
    %19 = vector.load %arg4[%c0_7, %c0_8] : memref<128x256xf32, #tpu.memory_space<vmem>>, vector<128x256xf32>
    %cst_9 = arith.constant dense<0.000000e+00> : vector<64x256xf32>
    %20 = tpu.matmul %18, %19, %cst_9 {dimension_numbers = #tpu.dot_dimension_numbers<[1], [0], [0], [1], [0, 0, 1, 1], [], []>} : vector<64x128xf32>, vector<128x256xf32>, vector<64x256xf32> -> vector<64x256xf32>
    %c0_i32 = arith.constant 0 : i32
    %21 = arith.cmpi eq, %arg1, %c0_i32 : i32
    %22 = arith.extui %21 : i1 to i32
    %c0_i32_10 = arith.constant 0 : i32
    %23 = arith.cmpi ne, %22, %c0_i32_10 : i32
    scf.if %23 {
      %c0_14 = arith.constant 0 : index
      %c0_15 = arith.constant 0 : index
      %30 = vector.load %arg6[%c0_14, %c0_15] : memref<64x256xf32, #tpu.memory_space<vmem>>, vector<64x256xf32>
      tpu.vector_store %arg6[%c0_14, %c0_15], %20 {strides = array<i32>} : memref<64x256xf32, #tpu.memory_space<vmem>>, vector<64x256xf32>,
    } else {
    }
    %c0_i32_11 = arith.constant 0 : i32
    %24 = arith.cmpi sgt, %arg1, %c0_i32_11 : i32
    %25 = arith.extui %24 : i1 to i32
    %c0_i32_12 = arith.constant 0 : i32
    %26 = arith.cmpi ne, %25, %c0_i32_12 : i32
    scf.if %26 {
      %c0_14 = arith.constant 0 : index
      %c0_15 = arith.constant 0 : index
      %30 = vector.load %arg6[%c0_14, %c0_15] : memref<64x256xf32, #tpu.memory_space<vmem>>, vector<64x256xf32>
      %31 = arith.addf %30, %20 : vector<64x256xf32>
      %c0_16 = arith.constant 0 : index
      %c0_17 = arith.constant 0 : index
      %32 = vector.load %arg6[%c0_16, %c0_17] : memref<64x256xf32, #tpu.memory_space<vmem>>, vector<64x256xf32>
      tpu.vector_store %arg6[%c0_16, %c0_17], %31 {strides = array<i32>} : memref<64x256xf32, #tpu.memory_space<vmem>>, vector<64x256xf32>,
    } else {
    }
    %c3_i32 = arith.constant 3 : i32
    %27 = arith.cmpi eq, %arg1, %c3_i32 : i32
    %28 = arith.extui %27 : i1 to i32
    %c0_i32_13 = arith.constant 0 : i32
    %29 = arith.cmpi ne, %28, %c0_i32_13 : i32
    scf.if %29 {
      %c0_14 = arith.constant 0 : index
      %c0_15 = arith.constant 0 : index
      %30 = vector.load %arg6[%c0_14, %c0_15] : memref<64x256xf32, #tpu.memory_space<vmem>>, vector<64x256xf32>
      %c0_16 = arith.constant 0 : index
      %c0_17 = arith.constant 0 : index
      %31 = vector.load %arg5[%c0_16, %c0_17] : memref<64x256xf32, #tpu.memory_space<vmem>>, vector<64x256xf32>
      tpu.vector_store %arg5[%c0_16, %c0_17], %30 {strides = array<i32>} : memref<64x256xf32, #tpu.memory_space<vmem>>, vector<64x256xf32>,
    } else {
    }
    return
  }
  func.func @transform_0(%arg0: i32, %arg1: i32) -> (i32, i32) {
    %c0_i32 = arith.constant 0 : i32
    %c0_i32_0 = arith.constant 0 : i32
    return %arg0, %c0_i32 : i32, i32
  }
  func.func @transform_1(%arg0: i32, %arg1: i32) -> (i32, i32) {
    %c0_i32 = arith.constant 0 : i32
    %c0_i32_0 = arith.constant 0 : i32
    return %c0_i32, %arg1 : i32, i32
  }
  func.func @transform_2(%arg0: i32, %arg1: i32) -> (i32, i32) {
    %c0_i32 = arith.constant 0 : i32
    %c0_i32_0 = arith.constant 0 : i32
    return %arg1, %c0_i32 : i32, i32
  }
  func.func @transform_3(%arg0: i32, %arg1: i32) -> (i32, i32) {
    %c0_i32 = arith.constant 0 : i32
    %c0_i32_0 = arith.constant 0 : i32
    return %arg0, %c0_i32 : i32, i32
  }
}

</mosaic_0001>

<bundles_post_ra>
// kernel: tpu_custom_call.1
= control target key start
LH: loop header
LB: loop body
LE: loop exit
PB: predicated region body
PF: predicated region fallthrough
CT: control target
= control target key end

     0   :  { %s1981_s0 = inlined_call_operand.hbm [shape: f32[144,256], index: 0, kind: input, shape index: {}]   ;;  %s1982_s1 = inlined_call_operand.hbm [shape: f32[256,1024], index: 1, kind: input, shape index: {}]   ;;  %s1983_s2 = inlined_call_operand.hbm [shape: f32[512,256], index: 2, kind: input, shape index: {}]   ;;  %s1984_s3 = inlined_call_operand.hbm [shape: f32[144,256], index: 3, kind: output, shape index: {}]  }
   0x1   :  { %1996 = sst [smem:[#allocation23_spill]] %s1981_s0 }
   0x2   :  { %1997 = sst [smem:[#allocation24_spill]] %s1984_s3 }
   0x3   :  { %8 = vsyncpa [#allocation4], 0 }
   0x4   :  { %10 = vsyncpa [#allocation4 + $0x1], 0 }
   0x5   :  { %11 = vsyncpa [#allocation7], 0 }
   0x6   :  { %13 = vsyncpa [#allocation7 + $0x1], 0 }
   0x7   :  { %14 = vsyncpa [#allocation5], 0 }
   0x8   :  { %16 = vsyncpa [#allocation5 + $0x1], 0  ;;  %s1471_s12 = smov 0   ;;  %s1473_s13 = smov 0  }
   0x9   :  { %s1475_s14 = smov 0   ;;  %s1477_s15 = smov 0  }
   0xa   :  { %s1479_s16 = smov 0   ;;  %s1481_s17 = smov 0  }
   0xb   :  { %s1483_s18 = smov 0   ;;  %s1485_s19 = smov 0  }
   0xc   :  { %s1487_s20 = smov 0   ;;  %s1489_s21 = smov 0  }
   0xd   :  { %s1491_s22 = smov 0  }
   0xe LB: > { %1998 = sst [smem:[#allocation13_spill]] %s1408_s14  ;;  %s1527_s23 = sadd.s32 4294967295, %s1440_s22   ;;  %s1440_s22 = sphi %s1491_s22, %s22_s22   ;;  %s1436_s21 = sphi %s1489_s21, %s2029_s21   ;;  %s1432_s20 = sphi %s1487_s20, %s2035_s20   ;;  %s1428_s19 = sphi %s1485_s19, %s2027_s19   ;;  %s1424_s18 = sphi %s1483_s18, %s2034_s18   ;;  %s1420_s17 = sphi %s1481_s17, %s2026_s17   ;;  %s1416_s16 = sphi %s1479_s16, %s2033_s16   ;;  %s1412_s15 = sphi %s1477_s15, %s2032_s15   ;;  %s1408_s14 = sphi %s1475_s14, %s2024_s14   ;;  %s1404_s13 = sphi %s1473_s13, %s2031_s13   ;;  %s1400_s12 = sphi %s1471_s12, %s2030_s12  }
   0xf   : > { %1999 = sst [smem:[#allocation14_spill]] %s1412_s15  ;;  %s1007_s24 = sadd.s32 4294967294, %s1440_s22  }
  0x10   : > { %2000 = sst [smem:[#allocation15_spill]] %s1420_s17  ;;  %s31_s25 = sadd.s32 1, %s1432_s20 }
  0x11   : > { %2001 = sst [smem:[#allocation16_spill]] %s1428_s19  ;;  %s34_s26 = sadd.s32 1, %s1436_s21 }
  0x12   : > { %2002 = sst [smem:[#allocation17_spill]] %s1436_s21  ;;  %p32_p0 = scmp.ge.s32.totalorder %s31_s25, 4 }
  0x13   : > { %s41_s27 = sadd.s32 1, %s1420_s17  ;;  %p48_p1 = scmp.ne.s32.totalorder %s1420_s17, %s1416_s16 }
  0x14   : > { %p49_p2 = scmp.eq.s32.totalorder %s1440_s22, 0  ;;  %s2037_s25 = smov (%p32_p0, %s31_s25), 0 }
  0x15   : > { %2003 = sst [smem:[#allocation18_spill]] %s2037_s25  ;;  %s2039_s26 = smov (!%p32_p0, %s34_s26), %s1436_s21 }
  0x16   : > { %p1544_p3 = por %p49_p2, %p48_p1  ;;  %p1985_p4 = scmp.ne.s32.totalorder %s1416_s16, %s1412_s15 }
  0x17   : > { %p36_p5 = scmp.ge.s32.totalorder %s2039_s26, 3  ;;  %p55_p6 = scmp.eq.s32.totalorder %s1527_s23, 0 }
  0x18   : > { %s64_s29 = ssub.s32 %s1432_s20, %s2037_s25  ;;  %s67_s30 = sadd.s32 1, %s1408_s14 }
  0x19   : > { %s2041_s26 = smov (%p36_p5, %s2039_s26), 0  ;;  %p1561_p7 = por %p55_p6, %p1985_p4 }
  0x1a   : > { %2005 = sst [smem:[#allocation19_spill]] %s2041_s26  ;;  %p65_p8 = scmp.eq.s32.totalorder %s64_s29, 0 }
  0x1b   : > { %s38_s5 = ssub.s32 %s1436_s21, %s2041_s26  ;;  %p74_p9 = scmp.ne.s32.totalorder %s1408_s14, %s1404_s13 }
  0x1c   : > { %p39_p10 = scmp.eq.s32.totalorder %s38_s5, 0  ;;  %p80_p11 = scmp.ne.s32.totalorder %s1404_s13, %s1400_s12 }
  0x1d   : > { %s1572_s6 = scalar_select %p65_p8, %s1408_s14, %s67_s30  }
  0x1e   : > { %s1575_s7 = scalar_select %p39_p10, %s1420_s17, %s41_s27  }
  0x1f   : > { %2007 = sst [smem:[#allocation20_spill]] %s1572_s6  ;;  %p1579_p12 = por %p74_p9, %p49_p2 }
  0x20   : > { %2008 = sst [smem:[#allocation21_spill]] %s1575_s7  ;;  %p1585_p13 = por %p80_p11, %p55_p6 }
  0x21   : > { %p130_p0 = scmp.eq.s32.totalorder %s1527_s23, 11  ;;  %p136_p5 = scmp.eq.s32.totalorder %s1007_s24, 11 }
  0x22   : > { %p2012_p8 = scmp.ne.s32.totalorder %s1416_s16, %s1412_s15  ;;  %p1009_p2 = scmp.ge.s32.totalorder %s1440_s22, 12 }
  0x23   : > { %p1593_p4 = por %p130_p0, %p48_p1 }
  0x24   : > { %p1600_p10 = por %p136_p5, %p2012_p8  ;;  %152 = sbr.rel (%p1009_p2) target bundleno = 95 (0x5f), region = 16 }
  0x26   : > { %s2013_s11 = scalar_select %p1600_p10, 1, 0 }
  0x28   : > { %2014 = sst [smem:[#allocation22_spill]] %s2013_s11 }
  0x29   : > { %155 = sbr.rel (!%p1544_p3) target bundleno = 84 (0x54), region = 20  ;;  %s156_s12 = sand.u32 (%p1544_p3), 1, %s1420_s17  }
  0x2a   : > { %s1011_s24 = sshll.u32 (%p1544_p3), %s1436_s21, 3  ;;  %s1010_s27 = sshll.u32 (%p1544_p3), %s156_s12, 7 }
  0x2b   : > { %s162_s29 = ssub.s32 (%p1544_p3), 18, %s1011_s24  ;;  %s1612_s25 = scalar_lea.sflag (%p1544_p3), [#allocation4], %s156_s12 }
  0x2c   : > { %p163_p1 = scmp.lt.s32.totalorder (%p1544_p3), %s162_s29, 8  ;;  %s160_s7 = scalar_lea.vmem (%p1544_p3), [#allocation3], %s1010_s27 }
  0x2e   : > { %s2043_s29 = smov (!%p163_p1, %s162_s29), 8 }
  0x2f   : > { %s1045_s30 = sshll.u32 %s2043_s29, 4 }
  0x30   : > { %s167_s5 = ssub.s32 128, %s1045_s30 }
  0x31   : > { %s168_s26 = sshll.u32 %s167_s5, 4 }
  0x32   : > { %169 = vsyncadd %s1612_s25, %s168_s26  ;;  %p1615_p3 = scmp.ne.s32.totalorder %s1045_s30, 0  ;;  %s1047_s24 = sshll.u32 %s1436_s21, 7 }
  0x33   : > { %s2016_s0 = sld [smem:[#allocation23_spill]]  ;;  %s1623_s15 = sshll.u32 %s160_s7, 4  ;;  %s178_s15 = int_to_ptr.vmem [resolvable:$true] %s1623_s15 }
  0x34   : > { %s1991_s26 = sshll.u32 %s2043_s29, 8 }
  0x35   : > { %s1210_s30 = sshrl.u32 %s1991_s26, 4 }
  0x39   : > { %s173_s11 = scalar_lea.hbm %s2016_s0, %s1047_s24  ;;  %s1219_s7 = scalar_lea.hbm %s2016_s0, 288 }
  0x3a   : > { %s175_s12 = sshll.u32 %s173_s11, 4  ;;  %s1626_s12 = int_to_ptr.hbm [resolvable:$true] %s175_s12 }
  0x3b   : > { %s1208_s27 = sshra.s32 %s1626_s12, 4  ;;  %s1209_s27 = int_to_ptr.hbm [resolvable:$true] %s1208_s27 }
  0x3c   : > { %s1215_s5 = scalar_lea.hbm %s1209_s27, %s1210_s30 }
  0x3d   : > { %p1216_p6 = scmp.ne.s32.totalorder %s1209_s27, %s1215_s5  ;;  %p1221_p0 = scmp.lt.s32.totalorder %s1219_s7, %s1215_s5 }
  0x3f   : > { %p1217_p9 = pnand %p1216_p6, %p1615_p3 }
  0x41   : > { %p1218_p11 = pneg %p1217_p9 }
  0x43   : > { %p1223_p5 = pnand %p1221_p0, %p1218_p11 }
  0x45   : > { %1226 = shalt.err (!%p1223_p5)
}
  0x46   : > { %s1227_s11 = sshra.s32 %s178_s15, 4  ;;  %s1442_s27 = smov [#allocation3]   ;;  %s1228_s11 = int_to_ptr.vmem [resolvable:$true] %s1227_s11 }
  0x47   : > { %s1234_s24 = scalar_lea.vmem %s1228_s11, %s1210_s30  ;;  %s1238_s26 = scalar_lea.vmem %s1442_s27, 256 }
  0x48   : > { %p1235_p8 = scmp.ne.s32.totalorder %s1228_s11, %s1234_s24  ;;  %p1240_p6 = scmp.lt.s32.totalorder %s1238_s26, %s1234_s24 }
  0x4a   : > { %p1236_p2 = pnand %p1235_p8, %p1615_p3 }
  0x4c   : > { %p1237_p1 = pneg %p1236_p2 }
  0x4e   : > { %p1242_p9 = pnand %p1240_p6, %p1237_p1 }
  0x50   : > { %1245 = shalt.err (!%p1242_p9)
}
  0x51   : > { %s1443_s17 = smov 256   ;;  %s1444_s5 = smov 16  }
  0x52   : > { %s2017_s6 = sshll.u32 %s2043_s29, 8 }
  0x53   : > { %183 = dma.hbm_to_vmem [thread:$0]  (%p1615_p3), %s1626_s12, %s2017_s6, %s178_s15, %s1612_s25, %s1443_s17, %s1443_s17, %s1444_s5  }
  0x54 PF: > { %s187_s30 = sand.u32 1, %s1440_s22   ;;  %s189_s26 = sand.u32 1, %s1408_s14  }
  0x55   : > { %s1019_s7 = sshll.u32 %s189_s26, 9  ;;  %s1048_s11 = sshll.u32 %s1432_s20, 4 }
  0x56   : > { %s196_s0 = scalar_lea.hbm %s1982_s1, %s1048_s11  ;;  %s191_s21 = scalar_lea.vmem [#allocation6], %s1019_s7 }
  0x57   : > { %s199_s3 = sshll.u32 %s191_s21, 4  ;;  %s197_s28 = sshll.u32 %s196_s0, 4  ;;  %s200_s3 = int_to_ptr.vmem [resolvable:$true] %s199_s3  ;;  %s198_s28 = int_to_ptr.hbm [resolvable:$true] %s197_s28 }
  0x58   : > { %s188_s15 = scalar_lea.sflag [#allocation7], %s187_s30  ;;  %s1445_s25 = smov 1024  }
  0x59   : > { %s1446_s29 = smov 256   ;;  %s1447_s12 = smov 16  }
  0x5a   : > { %1086 = dma.hbm_to_vmem [thread:$0]  (%p1579_p12), %s198_s28, 8192, %s200_s3, %s188_s15, %s1445_s25, %s1446_s29, %s1447_s12  }
  0x5b   : > { %s1022_s17 = sshll.u32 %s189_s26, 8  ;;  %s1050_s5 = sshll.u32 %s1432_s20, 8 }
  0x5c   : > { %s219_s19 = scalar_lea.hbm %s1983_s2, %s1050_s5  ;;  %s213_s11 = scalar_lea.vmem [#allocation8], %s1022_s17 }
  0x5d   : > { %s220_s24 = sshll.u32 %s219_s19, 4  ;;  %s222_s7 = sshll.u32 %s213_s11, 4  ;;  %s221_s24 = int_to_ptr.hbm [resolvable:$true] %s220_s24  ;;  %s223_s7 = int_to_ptr.vmem [resolvable:$true] %s222_s7 }
  0x5e   : > { %1087 = dma.hbm_to_vmem [thread:$0]  (%p1579_p12), %s221_s24, 4096, %s223_s7, %s188_s15, %s1446_s29, %s1446_s29, %s1447_s12  }
  0x5f PF: > { %p1026_p3 = scmp.ge.s32.totalorder %s1440_s22, 1  ;;  %p230_p11 = scmp.lt.s32.totalorder %s1440_s22, 13 }
  0x61   : > { %p231_p0 = pnand %p1026_p3, %p230_p11 }
  0x62   : > { %s1666_s0 = sand.u32 (!%p231_p0), 1, %s1416_s16  }
  0x63   : > { %234 = sbr.rel (%p231_p0) target bundleno = 604 (0x25c), region = 32  ;;  %s1027_s3 = sshll.u32 (!%p231_p0), %s1666_s0, 7 }
  0x64   : > { %s237_s14 = scalar_lea.sflag (!%p231_p0), [#allocation4], %s1666_s0  ;;  %s1672_s19 = scalar_lea.vmem (!%p231_p0), [#allocation3], %s1027_s3 }
  0x68   : > { %1387 = dma.done.wait (%p1561_p7), %s237_s14, 2048  }
  0x69   : > { %1389 = vsyncadd (%p1561_p7), %s237_s14, 4294965248  ;;  %s246_s21 = sand.u32 1, %s1527_s23   ;;  %s248_s8 = sand.u32 1, %s1404_s13  }
  0x6a   : > { %s1028_s30 = sshll.u32 %s248_s8, 9  ;;  %s247_s26 = scalar_lea.sflag [#allocation7], %s246_s21 }
  0x6b   : > { %s1682_s27 = scalar_lea.vmem [#allocation6], %s1028_s30 }
  0x6c   : > { %1391 = dma.done.wait (%p1585_p13), %s247_s26, 12288  }
  0x6d   : > { %1393 = vsyncadd (%p1585_p13), %s247_s26, 4294955008  ;;  %v354_v0 = vld [vmem:[%s1682_s27 + $0xf0] sm:$0xff]  ;;  %v352_v2 = vld [vmem:[%s1682_s27 + $0xe0] sm:$0xff]  ;;  %s1029_s23 = sshll.u32 %s248_s8, 8  ;;  %s1872_s9 = scalar_lea.vmem [#allocation9], %s1027_s3 }
  0x6e   : > { %v386_v1 = vld [vmem:[%s1682_s27 + $0x1f0] sm:$0xff]  ;;  %388 = vmatpush.msra.mxu0 %v354_v0  ;;  %1054 = vmatpush.msra.mxu2 %v354_v0  ;;  %v384_v3 = vld [vmem:[%s1682_s27 + $0x1e0] sm:$0xff]  ;;  %v1727_v34 = vld [vmem:[%s1672_s19 + $0x8] sm:$0xff]  ;;  %s1802_s4 = scalar_lea.vmem [#allocation8], %s1029_s23  ;;  %p1031_p7 = scmp.ne.s32.totalorder %s1424_s18, 0 }
  0x6f   : > { %429 = vmatpush.msra.mxu1 %v386_v1  ;;  %1070 = vmatpush.msra.mxu3 %v386_v1  ;;  %v350_v4 = vld [vmem:[%s1682_s27 + $0xd0] sm:$0xff]  ;;  %v348_v6 = vld [vmem:[%s1682_s27 + $0xc0] sm:$0xff]  ;;  %v1730_v35 = vld [vmem:[%s1672_s19 + $0x48] sm:$0xff] }
  0x70   : > { %389 = vmatpush.msra.mxu0 %v352_v2  ;;  %1055 = vmatpush.msra.mxu2 %v352_v2  ;;  %v382_v5 = vld [vmem:[%s1682_s27 + $0x1d0] sm:$0xff]  ;;  %v380_v7 = vld [vmem:[%s1682_s27 + $0x1c0] sm:$0xff]  ;;  %v355_v36 = vld [vmem:[%s1682_s27 + $0xf8] sm:$0xff] }
  0x71   : > { %430 = vmatpush.msra.mxu1 %v384_v3  ;;  %1071 = vmatpush.msra.mxu3 %v384_v3  ;;  %v346_v8 = vld [vmem:[%s1682_s27 + $0xb0] sm:$0xff]  ;;  %v344_v10 = vld [vmem:[%s1682_s27 + $0xa0] sm:$0xff]  ;;  %v387_v37 = vld [vmem:[%s1682_s27 + $0x1f8] sm:$0xff] }
  0x72   : > { %390 = vmatpush.msra.mxu0 %v350_v4  ;;  %1056 = vmatpush.msra.mxu2 %v350_v4  ;;  %v378_v9 = vld [vmem:[%s1682_s27 + $0x1b0] sm:$0xff]  ;;  %v376_v11 = vld [vmem:[%s1682_s27 + $0x1a0] sm:$0xff]  ;;  %v353_v38 = vld [vmem:[%s1682_s27 + $0xe8] sm:$0xff] }
  0x73   : > { %431 = vmatpush.msra.mxu1 %v382_v5  ;;  %1072 = vmatpush.msra.mxu3 %v382_v5  ;;  %v342_v12 = vld [vmem:[%s1682_s27 + $0x90] sm:$0xff]  ;;  %v340_v14 = vld [vmem:[%s1682_s27 + $0x80] sm:$0xff]  ;;  %v385_v39 = vld [vmem:[%s1682_s27 + $0x1e8] sm:$0xff] }
  0x74   : > { %391 = vmatpush.msra.mxu0 %v348_v6  ;;  %1057 = vmatpush.msra.mxu2 %v348_v6  ;;  %v374_v13 = vld [vmem:[%s1682_s27 + $0x190] sm:$0xff]  ;;  %v372_v15 = vld [vmem:[%s1682_s27 + $0x180] sm:$0xff]  ;;  %v351_v40 = vld [vmem:[%s1682_s27 + $0xd8] sm:$0xff] }
  0x75   : > { %432 = vmatpush.msra.mxu1 %v380_v7  ;;  %1073 = vmatpush.msra.mxu3 %v380_v7  ;;  %v338_v16 = vld [vmem:[%s1682_s27 + $0x70] sm:$0xff]  ;;  %v336_v18 = vld [vmem:[%s1682_s27 + $0x60] sm:$0xff]  ;;  %v383_v41 = vld [vmem:[%s1682_s27 + $0x1d8] sm:$0xff] }
  0x76   : > { %392 = vmatpush.msra.mxu0 %v346_v8  ;;  %1058 = vmatpush.msra.mxu2 %v346_v8  ;;  %v370_v17 = vld [vmem:[%s1682_s27 + $0x170] sm:$0xff]  ;;  %v368_v19 = vld [vmem:[%s1682_s27 + $0x160] sm:$0xff]  ;;  %v349_v42 = vld [vmem:[%s1682_s27 + $0xc8] sm:$0xff] }
  0x77   : > { %433 = vmatpush.msra.mxu1 %v378_v9  ;;  %1074 = vmatpush.msra.mxu3 %v378_v9  ;;  %v334_v20 = vld [vmem:[%s1682_s27 + $0x50] sm:$0xff]  ;;  %v332_v22 = vld [vmem:[%s1682_s27 + $0x40] sm:$0xff]  ;;  %v381_v43 = vld [vmem:[%s1682_s27 + $0x1c8] sm:$0xff] }
  0x78   : > { %393 = vmatpush.msra.mxu0 %v344_v10  ;;  %1059 = vmatpush.msra.mxu2 %v344_v10  ;;  %v366_v21 = vld [vmem:[%s1682_s27 + $0x150] sm:$0xff]  ;;  %v364_v23 = vld [vmem:[%s1682_s27 + $0x140] sm:$0xff]  ;;  %v1751_v46 = vld [vmem:[%s1672_s19 + $0x18] sm:$0xff] }
  0x79   : > { %434 = vmatpush.msra.mxu1 %v376_v11  ;;  %1075 = vmatpush.msra.mxu3 %v376_v11  ;;  %v330_v24 = vld [vmem:[%s1682_s27 + $0x30] sm:$0xff]  ;;  %v328_v26 = vld [vmem:[%s1682_s27 + $0x20] sm:$0xff]  ;;  %v1754_v47 = vld [vmem:[%s1672_s19 + $0x58] sm:$0xff] }
  0x7a   : > { %394 = vmatpush.msra.mxu0 %v342_v12  ;;  %1060 = vmatpush.msra.mxu2 %v342_v12  ;;  %v362_v25 = vld [vmem:[%s1682_s27 + $0x130] sm:$0xff]  ;;  %v360_v27 = vld [vmem:[%s1682_s27 + $0x120] sm:$0xff]  ;;  %v347_v48 = vld [vmem:[%s1682_s27 + $0xb8] sm:$0xff] }
  0x7b   : > { %435 = vmatpush.msra.mxu1 %v374_v13  ;;  %1076 = vmatpush.msra.mxu3 %v374_v13  ;;  %v326_v28 = vld [vmem:[%s1682_s27 + $0x10] sm:$0xff]  ;;  %v324_v30 = vld [vmem:[%s1682_s27] sm:$0xff]  ;;  %v379_v49 = vld [vmem:[%s1682_s27 + $0x1b8] sm:$0xff] }
  0x7c   : > { %395 = vmatpush.msra.mxu0 %v340_v14  ;;  %1061 = vmatpush.msra.mxu2 %v340_v14  ;;  %v358_v29 = vld [vmem:[%s1682_s27 + $0x110] sm:$0xff]  ;;  %v356_v31 = vld [vmem:[%s1682_s27 + $0x100] sm:$0xff]  ;;  %v345_v50 = vld [vmem:[%s1682_s27 + $0xa8] sm:$0xff] }
  0x7d   : > { %436 = vmatpush.msra.mxu1 %v372_v15  ;;  %1077 = vmatpush.msra.mxu3 %v372_v15  ;;  %v1721_v32 = vld [vmem:[%s1672_s19] sm:$0xff]  ;;  %v1745_v44 = vld [vmem:[%s1672_s19 + $0x10] sm:$0xff]  ;;  %v377_v51 = vld [vmem:[%s1682_s27 + $0x1a8] sm:$0xff] }
  0x7e   : > { %396 = vmatpush.msra.mxu0 %v338_v16  ;;  %1062 = vmatpush.msra.mxu2 %v338_v16  ;;  %v1724_v33 = vld [vmem:[%s1672_s19 + $0x40] sm:$0xff]  ;;  %v1748_v45 = vld [vmem:[%s1672_s19 + $0x50] sm:$0xff]  ;;  %v343_v52 = vld [vmem:[%s1682_s27 + $0x98] sm:$0xff] }
  0x7f   : > { %437 = vmatpush.msra.mxu1 %v370_v17  ;;  %1078 = vmatpush.msra.mxu3 %v370_v17  ;;  %v375_v53 = vld [vmem:[%s1682_s27 + $0x198] sm:$0xff]  ;;  %v341_v54 = vld [vmem:[%s1682_s27 + $0x88] sm:$0xff]  ;;  %v312_v56 = vld [vmem:[%s1672_s19 + $0x20] sm:$0xff] }
  0x80   : > { %397 = vmatpush.msra.mxu0 %v336_v18  ;;  %1063 = vmatpush.msra.mxu2 %v336_v18  ;;  %v373_v55 = vld [vmem:[%s1682_s27 + $0x188] sm:$0xff]  ;;  %v320_v57 = vld [vmem:[%s1672_s19 + $0x60] sm:$0xff]  ;;  %v339_v60 = vld [vmem:[%s1682_s27 + $0x78] sm:$0xff] }
  0x81   : > { %438 = vmatpush.msra.mxu1 %v368_v19  ;;  %1079 = vmatpush.msra.mxu3 %v368_v19  ;;  %v313_v58 = vld [vmem:[%s1672_s19 + $0x28] sm:$0xff]  ;;  %v371_v61 = vld [vmem:[%s1682_s27 + $0x178] sm:$0xff]  ;;  %v314_v4 = vld [vmem:[%s1672_s19 + $0x30] sm:$0xff] }
  0x82   : > { %398 = vmatpush.msra.mxu0 %v334_v20  ;;  %1064 = vmatpush.msra.mxu2 %v334_v20  ;;  %v321_v59 = vld [vmem:[%s1672_s19 + $0x68] sm:$0xff]  ;;  %v335_v0 = vld [vmem:[%s1682_s27 + $0x58] sm:$0xff]  ;;  %v322_v5 = vld [vmem:[%s1672_s19 + $0x70] sm:$0xff] }
  0x83   : > { %439 = vmatpush.msra.mxu1 %v366_v21  ;;  %1080 = vmatpush.msra.mxu3 %v366_v21  ;;  %v337_v62 = vld [vmem:[%s1682_s27 + $0x68] sm:$0xff]  ;;  %v367_v1 = vld [vmem:[%s1682_s27 + $0x158] sm:$0xff]  ;;  %v662_v16 = vld [vmem:[%s1802_s4 + $0xf0] sm:$0xff] }
  0x84   : > { %399 = vmatpush.msra.mxu0 %v332_v22  ;;  %1065 = vmatpush.msra.mxu2 %v332_v22  ;;  %v369_v63 = vld [vmem:[%s1682_s27 + $0x168] sm:$0xff]  ;;  %v315_v6 = vld [vmem:[%s1672_s19 + $0x38] sm:$0xff]  ;;  %v660_v18 = vld [vmem:[%s1802_s4 + $0xe0] sm:$0xff] }
  0x85   : > { %440 = vmatpush.msra.mxu1 %v364_v23  ;;  %1081 = vmatpush.msra.mxu3 %v364_v23  ;;  %v333_v2 = vld [vmem:[%s1682_s27 + $0x48] sm:$0xff]  ;;  %v323_v7 = vld [vmem:[%s1672_s19 + $0x78] sm:$0xff]  ;;  %v658_v20 = vld [vmem:[%s1802_s4 + $0xd0] sm:$0xff] }
  0x86   : > { %400 = vmatpush.msra.mxu0 %v330_v24  ;;  %1066 = vmatpush.msra.mxu2 %v330_v24  ;;  %v365_v3 = vld [vmem:[%s1682_s27 + $0x148] sm:$0xff]  ;;  %v331_v8 = vld [vmem:[%s1682_s27 + $0x38] sm:$0xff]  ;;  %v656_v22 = vld [vmem:[%s1802_s4 + $0xc0] sm:$0xff] }
  0x87   : > { %441 = vmatpush.msra.mxu1 %v362_v25  ;;  %1082 = vmatpush.msra.mxu3 %v362_v25  ;;  %v363_v9 = vld [vmem:[%s1682_s27 + $0x138] sm:$0xff]  ;;  %v329_v10 = vld [vmem:[%s1682_s27 + $0x28] sm:$0xff]  ;;  %v654_v24 = vld [vmem:[%s1802_s4 + $0xb0] sm:$0xff] }
  0x88   : > { %401 = vmatpush.msra.mxu0 %v328_v26  ;;  %1067 = vmatpush.msra.mxu2 %v328_v26  ;;  %v361_v11 = vld [vmem:[%s1682_s27 + $0x128] sm:$0xff]  ;;  %v327_v12 = vld [vmem:[%s1682_s27 + $0x18] sm:$0xff]  ;;  %v652_v26 = vld [vmem:[%s1802_s4 + $0xa0] sm:$0xff] }
  0x89   : > { %442 = vmatpush.msra.mxu1 %v360_v27  ;;  %1083 = vmatpush.msra.mxu3 %v360_v27  ;;  %v359_v13 = vld [vmem:[%s1682_s27 + $0x118] sm:$0xff]  ;;  %v325_v14 = vld [vmem:[%s1682_s27 + $0x8] sm:$0xff] }
  0x8a   : > { %402 = vmatpush.msra.mxu0 %v326_v28  ;;  %1068 = vmatpush.msra.mxu2 %v326_v28  ;;  %v357_v15 = vld [vmem:[%s1682_s27 + $0x108] sm:$0xff]  ;;  %v663_v17 = vld [vmem:[%s1802_s4 + $0xf8] sm:$0xff]  ;;  %v650_v28 = vld [vmem:[%s1802_s4 + $0x90] sm:$0xff] }
  0x8b   : > { %443 = vmatpush.msra.mxu1 %v358_v29  ;;  %1084 = vmatpush.msra.mxu3 %v358_v29  ;;  %v661_v19 = vld [vmem:[%s1802_s4 + $0xe8] sm:$0xff]  ;;  %v659_v21 = vld [vmem:[%s1802_s4 + $0xd8] sm:$0xff] }
  0x8c   : > { %403 = vmatpush.msra.mxu0 %v324_v30  ;;  %1069 = vmatpush.msra.mxu2 %v324_v30  ;;  %v657_v23 = vld [vmem:[%s1802_s4 + $0xc8] sm:$0xff]  ;;  %v655_v25 = vld [vmem:[%s1802_s4 + $0xb8] sm:$0xff]  ;;  %v648_v30 = vld [vmem:[%s1802_s4 + $0x80] sm:$0xff] }
  0x8d   : > { %444 = vmatpush.msra.mxu1 %v356_v31  ;;  %1085 = vmatpush.msra.mxu3 %v356_v31  ;;  %v653_v27 = vld [vmem:[%s1802_s4 + $0xa8] sm:$0xff]  ;;  %v651_v29 = vld [vmem:[%s1802_s4 + $0x98] sm:$0xff] }
  0x8e   : > { %404 = vmatmul.f32.vlgmr.msra.gmra.mxu0 %v1721_v32  ;;  %416 = vmatmul.f32.vlgmr.msra.gmra.mxu2 %v1724_v33  ;;  %v649_v31 = vld [vmem:[%s1802_s4 + $0x88] sm:$0xff] }
  0x8f   : > { %445 = vmatmul.f32.vlgmr.msra.gmra.mxu1 %v1727_v34  ;;  %457 = vmatmul.f32.vlgmr.msra.gmra.mxu3 %v1730_v35 }
  0x90   : > { %470 = vmatpush.msrb.mxu2 %v355_v36  ;;  %511 = vmatpush.msrb.mxu3 %v387_v37  ;;  %v645_v36 = vld [vmem:[%s1802_s4 + $0x68] sm:$0xff] }
  0x91   : > { %664 = vmatpush.msrb.mxu0 %v662_v16  ;;  %705 = vmatpush.msrb.mxu1 %v663_v17 }
  0x92   : > { %471 = vmatpush.msrb.mxu2 %v353_v38  ;;  %512 = vmatpush.msrb.mxu3 %v385_v39  ;;  %v642_v38 = vld [vmem:[%s1802_s4 + $0x50] sm:$0xff]  ;;  %v643_v39 = vld [vmem:[%s1802_s4 + $0x58] sm:$0xff] }
  0x93   : > { %665 = vmatpush.msrb.mxu0 %v660_v18  ;;  %706 = vmatpush.msrb.mxu1 %v661_v19 }
  0x94   : > { %472 = vmatpush.msrb.mxu2 %v351_v40  ;;  %513 = vmatpush.msrb.mxu3 %v383_v41  ;;  %v640_v40 = vld [vmem:[%s1802_s4 + $0x40] sm:$0xff]  ;;  %v641_v41 = vld [vmem:[%s1802_s4 + $0x48] sm:$0xff] }
  0x95   : > { %666 = vmatpush.msrb.mxu0 %v658_v20  ;;  %707 = vmatpush.msrb.mxu1 %v659_v21 }
  0x96   : > { %473 = vmatpush.msrb.mxu2 %v349_v42  ;;  %514 = vmatpush.msrb.mxu3 %v381_v43  ;;  %v638_v42 = vld [vmem:[%s1802_s4 + $0x30] sm:$0xff] }
  0x97   : > { %407 = vmatmul.f32.gmra.mxu0 %v1745_v44  ;;  %419 = vmatmul.f32.gmra.mxu2 %v1748_v45 }
  0x98   : > { %448 = vmatmul.f32.gmra.mxu1 %v1751_v46  ;;  %460 = vmatmul.f32.gmra.mxu3 %v1754_v47 }
  0x99   : > { %474 = vmatpush.msrb.mxu2 %v347_v48  ;;  %515 = vmatpush.msrb.mxu3 %v379_v49  ;;  %v637_v48 = vld [vmem:[%s1802_s4 + $0x28] sm:$0xff] }
  0x9a   : > { %667 = vmatpush.msrb.mxu0 %v656_v22  ;;  %708 = vmatpush.msrb.mxu1 %v657_v23 }
  0x9b   : > { %475 = vmatpush.msrb.mxu2 %v345_v50  ;;  %516 = vmatpush.msrb.mxu3 %v377_v51 }
  0x9c   : > { %668 = vmatpush.msrb.mxu0 %v654_v24  ;;  %709 = vmatpush.msrb.mxu1 %v655_v25 }
  0x9d   : > { %476 = vmatpush.msrb.mxu2 %v343_v52  ;;  %517 = vmatpush.msrb.mxu3 %v375_v53  ;;  %v634_v52 = vld [vmem:[%s1802_s4 + $0x10] sm:$0xff]  ;;  %v635_v53 = vld [vmem:[%s1802_s4 + $0x18] sm:$0xff] }
  0x9e   : > { %669 = vmatpush.msrb.mxu0 %v652_v26  ;;  %710 = vmatpush.msrb.mxu1 %v653_v27 }
  0x9f   : > { %477 = vmatpush.msrb.mxu2 %v341_v54  ;;  %518 = vmatpush.msrb.mxu3 %v373_v55  ;;  %v632_v54 = vld [vmem:[%s1802_s4] sm:$0xff]  ;;  %v633_v55 = vld [vmem:[%s1802_s4 + $0x8] sm:$0xff] }
  0xa0   : > { %410 = vmatmul.f32.gmra.mxu0 %v312_v56  ;;  %422 = vmatmul.f32.gmra.mxu2 %v320_v57 }
  0xa1   : > { %451 = vmatmul.f32.gmra.mxu1 %v313_v58  ;;  %463 = vmatmul.f32.gmra.mxu3 %v321_v59 }
  0xa2   : > { %478 = vmatpush.msrb.mxu2 %v339_v60  ;;  %519 = vmatpush.msrb.mxu3 %v371_v61 }
  0xa3   : > { %670 = vmatpush.msrb.mxu0 %v650_v28  ;;  %711 = vmatpush.msrb.mxu1 %v651_v29 }
  0xa4   : > { %479 = vmatpush.msrb.mxu2 %v337_v62  ;;  %520 = vmatpush.msrb.mxu3 %v369_v63 }
  0xa5   : > { %671 = vmatpush.msrb.mxu0 %v648_v30  ;;  %712 = vmatpush.msrb.mxu1 %v649_v31 }
  0xa6   : > { %480 = vmatpush.msrb.mxu2 %v335_v0  ;;  %521 = vmatpush.msrb.mxu3 %v367_v1 }
  0xa8   : > { %481 = vmatpush.msrb.mxu2 %v333_v2  ;;  %522 = vmatpush.msrb.mxu3 %v365_v3 }
  0xa9   : > { %413 = vmatmul.f32.gmra.mxu0 %v314_v4  ;;  %425 = vmatmul.f32.gmra.mxu2 %v322_v5 }
  0xaa   : > { %454 = vmatmul.f32.gmra.mxu1 %v315_v6  ;;  %466 = vmatmul.f32.gmra.mxu3 %v323_v7 }
  0xab   : > { %482 = vmatpush.msrb.mxu2 %v331_v8  ;;  %523 = vmatpush.msrb.mxu3 %v363_v9 }
  0xad   : > { %483 = vmatpush.msrb.mxu2 %v329_v10  ;;  %524 = vmatpush.msrb.mxu3 %v361_v11 }
  0xaf   : > { %484 = vmatpush.msrb.mxu2 %v327_v12  ;;  %525 = vmatpush.msrb.mxu3 %v359_v13 }
  0xb1   : > { %485 = vmatpush.msrb.mxu2 %v325_v14  ;;  %526 = vmatpush.msrb.mxu3 %v357_v15 }
  0xb2   : > { %486 = vmatmul.f32.vlgmr.msrb.gmra.mxu2 %v1721_v32  ;;  %527 = vmatmul.f32.vlgmr.msrb.gmra.mxu3 %v1727_v34  ;;  %v646_v32 = vld [vmem:[%s1802_s4 + $0x70] sm:$0xff]  ;;  %v644_v34 = vld [vmem:[%s1802_s4 + $0x60] sm:$0xff] }
  0xb3   : > { %672 = vmatpush.msrb.mxu0 %v646_v32 }
  0xb5   : > { %673 = vmatpush.msrb.mxu0 %v644_v34 }
  0xb7   : > { %674 = vmatpush.msrb.mxu0 %v642_v38 }
  0xb9   : > { %675 = vmatpush.msrb.mxu0 %v640_v40 }
  0xba   : > { %489 = vmatmul.f32.gmra.mxu2 %v1745_v44  ;;  %530 = vmatmul.f32.gmra.mxu3 %v1751_v46 }
  0xbb   : > { %676 = vmatpush.msrb.mxu0 %v638_v42 }
  0xc2   : > { %492 = vmatmul.f32.gmra.mxu2 %v312_v56  ;;  %533 = vmatmul.f32.gmra.mxu3 %v313_v58 }
  0xca   : > { %495 = vmatmul.f32.gmra.mxu2 %v314_v4  ;;  %536 = vmatmul.f32.gmra.mxu3 %v315_v6 }
  0xd2   : > { %498 = vmatmul.f32.gmra.mxu2 %v1724_v33  ;;  %539 = vmatmul.f32.gmra.mxu3 %v1730_v35  ;;  %v647_v33 = vld [vmem:[%s1802_s4 + $0x78] sm:$0xff] }
  0xd3   : > { %713 = vmatpush.msrb.mxu1 %v647_v33 }
  0xd5   : > { %714 = vmatpush.msrb.mxu1 %v645_v36 }
  0xd7   : > { %715 = vmatpush.msrb.mxu1 %v643_v39 }
  0xd9   : > { %716 = vmatpush.msrb.mxu1 %v641_v41 }
  0xda   : > { %501 = vmatmul.f32.gmra.mxu2 %v1748_v45  ;;  %542 = vmatmul.f32.gmra.mxu3 %v1754_v47  ;;  %v639_v45 = vld [vmem:[%s1802_s4 + $0x38] sm:$0xff]  ;;  %v636_v47 = vld [vmem:[%s1802_s4 + $0x20] sm:$0xff] }
  0xdb   : > { %717 = vmatpush.msrb.mxu1 %v639_v45  ;;  %677 = vmatpush.msrb.mxu0 %v636_v47 }
  0xdd   : > { %718 = vmatpush.msrb.mxu1 %v637_v48  ;;  %678 = vmatpush.msrb.mxu0 %v634_v52 }
  0xdf   : > { %719 = vmatpush.msrb.mxu1 %v635_v53  ;;  %679 = vmatpush.msrb.mxu0 %v632_v54 }
  0xe1   : > { %720 = vmatpush.msrb.mxu1 %v633_v55 }
  0xe2   : > { %504 = vmatmul.f32.gmra.mxu2 %v320_v57  ;;  %545 = vmatmul.f32.gmra.mxu3 %v321_v59 }
  0xea   : > { %507 = vmatmul.f32.gmra.mxu2 %v322_v5  ;;  %548 = vmatmul.f32.gmra.mxu3 %v323_v7 }
 0x10b   : > { %v405_v35 = vpop.f32.mrf.mxu0 }
 0x10c   : > { %v446_v37 = vpop.f32.mrf.mxu1 }
 0x10d   : > { %v447_v43 = vadd.f32 %v446_v37, %v405_v35 }
 0x10f   : > { %v560_v50 = vmul.f32 0.044715, %v447_v43  ;;  %v552_v22 = vmul.f32 0.5, %v447_v43 }
 0x111   : > { %v417_v44 = vpop.f32.mrf.mxu2  ;;  %v568_v56 = vmul.f32 %v560_v50, %v447_v43 }
 0x112   : > { %v458_v46 = vpop.f32.mrf.mxu3 }
 0x113   : > { %v576_v62 = vmul.f32 %v568_v56, %v447_v43  ;;  %v1839_v19 = vadd.f32 %v458_v46, %v417_v44 }
 0x114   : > { %v408_v49 = vpop.f32.mrf.mxu0 }
 0x115   : > { %v449_v51 = vpop.f32.mrf.mxu1  ;;  %v584_v1 = vadd.f32 %v576_v62, %v447_v43  ;;  %v564_v24 = vmul.f32 0.044715, %v1839_v19 }
 0x116   : > { %v450_v57 = vadd.f32 %v449_v51, %v408_v49 }
 0x117   : > { %v592_v6 = vmul.f32 0.7978846, %v584_v1  ;;  %v572_v35 = vmul.f32 %v564_v24, %v1839_v19 }
 0x118   : > { %v561_v60 = vmul.f32 0.044715, %v450_v57  ;;  %v553_v36 = vmul.f32 0.5, %v450_v57 }
 0x119   : > { %1192 = vtanh.f32 %v592_v6  ;;  %v580_v42 = vmul.f32 %v572_v35, %v1839_v19 }
 0x11a   : > { %v420_v58 = vpop.f32.mrf.mxu2  ;;  %v569_v2 = vmul.f32 %v561_v60, %v450_v57 }
 0x11b   : > { %v461_v59 = vpop.f32.mrf.mxu3  ;;  %v588_v48 = vadd.f32 %v580_v42, %v1839_v19 }
 0x11c   : > { %v577_v7 = vmul.f32 %v569_v2, %v450_v57  ;;  %v1844_v33 = vadd.f32 %v461_v59, %v420_v58 }
 0x11d   : > { %v411_v61 = vpop.f32.mrf.mxu0  ;;  %v596_v55 = vmul.f32 0.7978846, %v588_v48 }
 0x11e   : > { %v452_v63 = vpop.f32.mrf.mxu1  ;;  %v585_v11 = vadd.f32 %v577_v7, %v450_v57  ;;  %v565_v38 = vmul.f32 0.044715, %v1844_v33 }
 0x11f   : > { %v453_v0 = vadd.f32 %v452_v63, %v411_v61  ;;  %v1193_v18 = vpop.eup %1192 }
 0x120   : > { %v593_v16 = vmul.f32 0.7978846, %v585_v11  ;;  %v608_v23 = vadd.f32 1.0, %v1193_v18  ;;  %v573_v49 = vmul.f32 %v565_v38, %v1844_v33 }
 0x121   : > { %v562_v5 = vmul.f32 0.044715, %v453_v0  ;;  %v554_v50 = vmul.f32 0.5, %v453_v0 }
 0x122   : > { %1194 = vtanh.f32 %v593_v16  ;;  %v616_v30 = vmul.f32 %v608_v23, %v552_v22  ;;  %v581_v56 = vmul.f32 %v573_v49, %v1844_v33 }
 0x123   : > { %v423_v3 = vpop.f32.mrf.mxu2  ;;  %v570_v12 = vmul.f32 %v562_v5, %v453_v0 }
 0x124   : > { %v464_v4 = vpop.f32.mrf.mxu3  ;;  %v589_v62 = vadd.f32 %v581_v56, %v1844_v33 }
 0x125   : > { %v578_v17 = vmul.f32 %v570_v12, %v453_v0  ;;  %v1850_v47 = vadd.f32 %v464_v4, %v423_v3 }
 0x126   : > { %v414_v8 = vpop.f32.mrf.mxu0  ;;  %v597_v5 = vmul.f32 0.7978846, %v589_v62 }
 0x127   : > { %v455_v9 = vpop.f32.mrf.mxu1  ;;  %v586_v20 = vadd.f32 %v578_v17, %v453_v0  ;;  %v566_v52 = vmul.f32 0.044715, %v1850_v47  ;;  %v558_v35 = vmul.f32 0.5, %v1850_v47 }
 0x128   : > { %v1836_v10 = vadd.f32 %v455_v9, %v414_v8  ;;  %v1195_v31 = vpop.eup %1194 }
 0x129   : > { %v594_v27 = vmul.f32 0.7978846, %v586_v20  ;;  %v609_v37 = vadd.f32 1.0, %v1195_v31  ;;  %v574_v63 = vmul.f32 %v566_v52, %v1850_v47 }
 0x12a   : > { %v563_v14 = vmul.f32 0.044715, %v1836_v10  ;;  %v555_v0 = vmul.f32 0.5, %v1836_v10 }
 0x12b   : > { %1196 = vtanh.f32 %v594_v27  ;;  %v617_v44 = vmul.f32 %v609_v37, %v553_v36  ;;  %v582_v6 = vmul.f32 %v574_v63, %v1850_v47 }
 0x12c   : > { %v426_v13 = vpop.f32.mrf.mxu2  ;;  %v571_v21 = vmul.f32 %v563_v14, %v1836_v10 }
 0x12d   : > { %v467_v15 = vpop.f32.mrf.mxu3  ;;  %v590_v12 = vadd.f32 %v582_v6, %v1850_v47 }
 0x12e   : > { %v579_v28 = vmul.f32 %v571_v21, %v1836_v10  ;;  %v468_v61 = vadd.f32 %v467_v15, %v426_v13 }
 0x12f   : > { %v598_v17 = vmul.f32 0.7978846, %v590_v12 }
 0x130   : > { %v587_v34 = vadd.f32 %v579_v28, %v1836_v10  ;;  %v567_v2 = vmul.f32 0.044715, %v468_v61  ;;  %v556_v10 = vmul.f32 0.5, %v1839_v19  ;;  %v559_v42 = vmul.f32 0.5, %v468_v61 }
 0x131   : > { %v1197_v45 = vpop.eup %1196 }
 0x132   : > { %v595_v41 = vmul.f32 0.7978846, %v587_v34  ;;  %v610_v51 = vadd.f32 1.0, %v1197_v45  ;;  %v575_v13 = vmul.f32 %v567_v2, %v468_v61 }
 0x134   : > { %1198 = vtanh.f32 %v595_v41  ;;  %v618_v58 = vmul.f32 %v610_v51, %v554_v50  ;;  %v583_v18 = vmul.f32 %v575_v13, %v468_v61 }
 0x135   : > { %v487_v25 = vpop.f32.mrf.mxu2  ;;  %v528_v26 = vpop.f32.mrf.mxu3  ;;  %1200 = vtanh.f32 %v596_v55 }
 0x136   : > { %v529_v29 = vadd.f32 %v528_v26, %v487_v25  ;;  %1202 = vtanh.f32 %v597_v5  ;;  %v591_v24 = vadd.f32 %v583_v18, %v468_v61  ;;  %v557_v26 = vmul.f32 0.5, %v1844_v33 }
 0x137   : > { %1204 = vtanh.f32 %v598_v17 }
 0x138   : > { %v624_v32 = vmul.f32 %v616_v30, %v529_v29  ;;  %v599_v29 = vmul.f32 0.7978846, %v591_v24 }
 0x13a   : > { %680 = vmatmul.f32.vlgmr.msrb.gmra.mxu0 %v624_v32  ;;  %721 = vmatmul.f32.vlgmr.msrb.gmra.mxu1 %v624_v32  ;;  %v1199_v59 = vpop.eup %1198  ;;  %1206 = vtanh.f32 %v599_v29 }
 0x13b   : > { %v611_v1 = vadd.f32 1.0, %v1199_v59  ;;  %v1201_v9 = vpop.eup %1200 }
 0x13c   : > { %v612_v14 = vadd.f32 1.0, %v1201_v9  ;;  %v1203_v22 = vpop.eup %1202 }
 0x13d   : > { %v490_v39 = vpop.f32.mrf.mxu2  ;;  %v531_v40 = vpop.f32.mrf.mxu3  ;;  %v619_v8 = vmul.f32 %v611_v1, %v555_v0  ;;  %v613_v25 = vadd.f32 1.0, %v1203_v22 }
 0x13e   : > { %v532_v43 = vadd.f32 %v531_v40, %v490_v39  ;;  %v620_v21 = vmul.f32 %v612_v14, %v556_v10  ;;  %v1205_v31 = vpop.eup %1204 }
 0x13f   : > { %v621_v19 = vmul.f32 %v613_v25, %v557_v26  ;;  %v614_v34 = vadd.f32 1.0, %v1205_v31 }
 0x140   : > { %v625_v46 = vmul.f32 %v617_v44, %v532_v43  ;;  %v1207_v40 = vpop.eup %1206 }
 0x141   : > { %v622_v39 = vmul.f32 %v614_v34, %v558_v35  ;;  %v615_v33 = vadd.f32 1.0, %v1207_v40 }
 0x142   : > { %683 = vmatmul.f32.gmra.mxu0 %v625_v46  ;;  %724 = vmatmul.f32.gmra.mxu1 %v625_v46 }
 0x143   : > { %v623_v46 = vmul.f32 %v615_v33, %v559_v42 }
 0x145   : > { %v493_v53 = vpop.f32.mrf.mxu2  ;;  %v534_v54 = vpop.f32.mrf.mxu3 }
 0x146   : > { %v535_v57 = vadd.f32 %v534_v54, %v493_v53 }
 0x148   : > { %v626_v60 = vmul.f32 %v618_v58, %v535_v57 }
 0x14a   : > { %686 = vmatmul.f32.gmra.mxu0 %v626_v60  ;;  %727 = vmatmul.f32.gmra.mxu1 %v626_v60 }
 0x14d   : > { %v496_v3 = vpop.f32.mrf.mxu2  ;;  %v537_v4 = vpop.f32.mrf.mxu3 }
 0x14e   : > { %v538_v7 = vadd.f32 %v537_v4, %v496_v3 }
 0x150   : > { %v627_v11 = vmul.f32 %v619_v8, %v538_v7 }
 0x152   : > { %689 = vmatmul.f32.gmra.mxu0 %v627_v11  ;;  %730 = vmatmul.f32.gmra.mxu1 %v627_v11 }
 0x155   : > { %v499_v15 = vpop.f32.mrf.mxu2  ;;  %v540_v16 = vpop.f32.mrf.mxu3 }
 0x156   : > { %v541_v20 = vadd.f32 %v540_v16, %v499_v15 }
 0x158   : > { %v628_v23 = vmul.f32 %v620_v21, %v541_v20 }
 0x15a   : > { %692 = vmatmul.f32.gmra.mxu0 %v628_v23  ;;  %733 = vmatmul.f32.gmra.mxu1 %v628_v23 }
 0x15d   : > { %v502_v27 = vpop.f32.mrf.mxu2  ;;  %v543_v28 = vpop.f32.mrf.mxu3 }
 0x15e   : > { %v544_v30 = vadd.f32 %v543_v28, %v502_v27 }
 0x160   : > { %v629_v32 = vmul.f32 %v621_v19, %v544_v30 }
 0x162   : > { %695 = vmatmul.f32.gmra.mxu0 %v629_v32  ;;  %736 = vmatmul.f32.gmra.mxu1 %v629_v32 }
 0x165   : > { %v505_v36 = vpop.f32.mrf.mxu2  ;;  %v546_v37 = vpop.f32.mrf.mxu3 }
 0x166   : > { %v547_v38 = vadd.f32 %v546_v37, %v505_v36 }
 0x168   : > { %v630_v41 = vmul.f32 %v622_v39, %v547_v38 }
 0x16a   : > { %698 = vmatmul.f32.gmra.mxu0 %v630_v41  ;;  %739 = vmatmul.f32.gmra.mxu1 %v630_v41 }
 0x16d   : > { %v508_v43 = vpop.f32.mrf.mxu2  ;;  %v549_v44 = vpop.f32.mrf.mxu3 }
 0x16e   : > { %v550_v45 = vadd.f32 %v549_v44, %v508_v43 }
 0x170   : > { %v631_v48 = vmul.f32 %v623_v46, %v550_v45 }
 0x172   : > { %701 = vmatmul.f32.gmra.mxu0 %v631_v48  ;;  %742 = vmatmul.f32.gmra.mxu1 %v631_v48 }
 0x1b7   : > { %v681_v49 = vpop.f32.mrf.mxu0  ;;  %v722_v47 = vpop.f32.mrf.mxu1 }
 0x1bf   : > { %v684_v50 = vpop.f32.mrf.mxu0  ;;  %v725_v51 = vpop.f32.mrf.mxu1 }
 0x1c7   : > { %v687_v52 = vpop.f32.mrf.mxu0  ;;  %v728_v53 = vpop.f32.mrf.mxu1 }
 0x1cf   : > { %v690_v54 = vpop.f32.mrf.mxu0  ;;  %v731_v55 = vpop.f32.mrf.mxu1 }
 0x1d7   : > { %v693_v56 = vpop.f32.mrf.mxu0  ;;  %v734_v57 = vpop.f32.mrf.mxu1 }
 0x1df   : > { %v696_v58 = vpop.f32.mrf.mxu0  ;;  %v737_v59 = vpop.f32.mrf.mxu1 }
 0x1e7   : > { %v699_v60 = vpop.f32.mrf.mxu0  ;;  %v1864_v61 = vpop.f32.mrf.mxu1 }
 0x1eb   : > { %749 = sbr.rel (%p1031_p7) target bundleno = 512 (0x200), region = 48 }
 0x1ef   : > { %v1866_v62 = vpop.f32.mrf.mxu0  ;;  %v1868_v63 = vpop.f32.mrf.mxu1 }
 0x1f0   : > { %750 = vst [vmem:[#allocation2 + $0x30] sm:$0xff] %v681_v49 }
 0x1f1   : > { %751 = vst [vmem:[#allocation2] sm:$0xff] %v722_v47 }
 0x1f2   : > { %752 = vst [vmem:[#allocation2 + $0x58] sm:$0xff] %v684_v50 }
 0x1f3   : > { %753 = vst [vmem:[#allocation2 + $0x18] sm:$0xff] %v725_v51 }
 0x1f4   : > { %754 = vst [vmem:[#allocation2 + $0x50] sm:$0xff] %v687_v52 }
 0x1f5   : > { %755 = vst [vmem:[#allocation2 + $0x68] sm:$0xff] %v728_v53 }
 0x1f6   : > { %756 = vst [vmem:[#allocation2 + $0x8] sm:$0xff] %v690_v54 }
 0x1f7   : > { %757 = vst [vmem:[#allocation2 + $0x48] sm:$0xff] %v731_v55 }
 0x1f8   : > { %758 = vst [vmem:[#allocation2 + $0x40] sm:$0xff] %v693_v56 }
 0x1f9   : > { %759 = vst [vmem:[#allocation2 + $0x20] sm:$0xff] %v734_v57 }
 0x1fa   : > { %760 = vst [vmem:[#allocation2 + $0x10] sm:$0xff] %v696_v58 }
 0x1fb   : > { %761 = vst [vmem:[#allocation2 + $0x38] sm:$0xff] %v737_v59 }
 0x1fc   : > { %762 = vst [vmem:[#allocation2 + $0x60] sm:$0xff] %v699_v60 }
 0x1fd   : > { %763 = vst [vmem:[#allocation2 + $0x70] sm:$0xff] %v1864_v61 }
 0x1fe   : > { %764 = vst [vmem:[#allocation2 + $0x78] sm:$0xff] %v1866_v62 }
 0x1ff   : > { %765 = vst [vmem:[#allocation2 + $0x28] sm:$0xff] %v1868_v63 }
 0x200 PF: > { %p1032_p12 = scmp.le.s32.totalorder %s1424_s18, 0 }
 0x202   : > { %769 = sbr.rel (%p1032_p12) target bundleno = 538 (0x21a), region = 52 }
 0x207   : > { %v770_v0 = vld [vmem:[#allocation2 + $0x30] sm:$0xff]  ;;  %v771_v1 = vld [vmem:[#allocation2] sm:$0xff]  ;;  %v772_v2 = vld [vmem:[#allocation2 + $0x58] sm:$0xff] }
 0x208   : > { %v786_v3 = vadd.f32 %v770_v0, %v681_v49  ;;  %v787_v4 = vadd.f32 %v771_v1, %v722_v47  ;;  %v788_v5 = vadd.f32 %v772_v2, %v684_v50  ;;  %v773_v6 = vld [vmem:[#allocation2 + $0x18] sm:$0xff]  ;;  %v774_v7 = vld [vmem:[#allocation2 + $0x50] sm:$0xff]  ;;  %v775_v8 = vld [vmem:[#allocation2 + $0x68] sm:$0xff] }
 0x209   : > { %v789_v9 = vadd.f32 %v773_v6, %v725_v51  ;;  %v776_v11 = vld [vmem:[#allocation2 + $0x8] sm:$0xff]  ;;  %v790_v12 = vadd.f32 %v774_v7, %v687_v52  ;;  %v791_v14 = vadd.f32 %v775_v8, %v728_v53  ;;  %v778_v10 = vld [vmem:[#allocation2 + $0x40] sm:$0xff]  ;;  %v780_v18 = vld [vmem:[#allocation2 + $0x10] sm:$0xff] }
 0x20a   : > { %802 = vst [vmem:[#allocation2 + $0x30] sm:$0xff] %v786_v3  ;;  %v777_v13 = vld [vmem:[#allocation2 + $0x48] sm:$0xff]  ;;  %v792_v15 = vadd.f32 %v776_v11, %v690_v54  ;;  %v779_v16 = vld [vmem:[#allocation2 + $0x20] sm:$0xff]  ;;  %v794_v20 = vadd.f32 %v778_v10, %v693_v56  ;;  %v781_v21 = vld [vmem:[#allocation2 + $0x38] sm:$0xff]  ;;  %v796_v24 = vadd.f32 %v780_v18, %v696_v58 }
 0x20b   : > { %803 = vst [vmem:[#allocation2] sm:$0xff] %v787_v4  ;;  %v793_v17 = vadd.f32 %v777_v13, %v731_v55  ;;  %v795_v22 = vadd.f32 %v779_v16, %v734_v57  ;;  %v782_v23 = vld [vmem:[#allocation2 + $0x60] sm:$0xff]  ;;  %v783_v25 = vld [vmem:[#allocation2 + $0x70] sm:$0xff]  ;;  %v797_v26 = vadd.f32 %v781_v21, %v737_v59  ;;  %v784_v27 = vld [vmem:[#allocation2 + $0x78] sm:$0xff] }
 0x20c   : > { %804 = vst [vmem:[#allocation2 + $0x58] sm:$0xff] %v788_v5  ;;  %v798_v28 = vadd.f32 %v782_v23, %v699_v60  ;;  %v785_v29 = vld [vmem:[#allocation2 + $0x28] sm:$0xff]  ;;  %v799_v30 = vadd.f32 %v783_v25, %v1864_v61  ;;  %v800_v19 = vadd.f32 %v784_v27, %v1866_v62 }
 0x20d   : > { %805 = vst [vmem:[#allocation2 + $0x18] sm:$0xff] %v789_v9  ;;  %v801_v31 = vadd.f32 %v785_v29, %v1868_v63 }
 0x20e   : > { %806 = vst [vmem:[#allocation2 + $0x50] sm:$0xff] %v790_v12 }
 0x20f   : > { %807 = vst [vmem:[#allocation2 + $0x68] sm:$0xff] %v791_v14 }
 0x210   : > { %808 = vst [vmem:[#allocation2 + $0x8] sm:$0xff] %v792_v15 }
 0x211   : > { %809 = vst [vmem:[#allocation2 + $0x48] sm:$0xff] %v793_v17 }
 0x212   : > { %810 = vst [vmem:[#allocation2 + $0x40] sm:$0xff] %v794_v20 }
 0x213   : > { %811 = vst [vmem:[#allocation2 + $0x20] sm:$0xff] %v795_v22 }
 0x214   : > { %812 = vst [vmem:[#allocation2 + $0x10] sm:$0xff] %v796_v24 }
 0x215   : > { %813 = vst [vmem:[#allocation2 + $0x38] sm:$0xff] %v797_v26 }
 0x216   : > { %814 = vst [vmem:[#allocation2 + $0x60] sm:$0xff] %v798_v28 }
 0x217   : > { %815 = vst [vmem:[#allocation2 + $0x70] sm:$0xff] %v799_v30 }
 0x218   : > { %816 = vst [vmem:[#allocation2 + $0x78] sm:$0xff] %v800_v19 }
 0x219   : > { %817 = vst [vmem:[#allocation2 + $0x28] sm:$0xff] %v801_v31 }
 0x21a PF: > { %p1033_p13 = scmp.ne.s32.totalorder %s1424_s18, 3 }
 0x21c   : > { %821 = sbr.rel (%p1033_p13) target bundleno = 562 (0x232), region = 56 }
 0x221   : > { %v822_v32 = vld [vmem:[#allocation2 + $0x30] sm:$0xff]  ;;  %v823_v34 = vld [vmem:[#allocation2] sm:$0xff]  ;;  %v824_v35 = vld [vmem:[#allocation2 + $0x58] sm:$0xff] }
 0x222   : > { %838 = vst [vmem:[%s1872_s9] sm:$0xff] %v822_v32  ;;  %v825_v36 = vld [vmem:[#allocation2 + $0x18] sm:$0xff]  ;;  %v826_v37 = vld [vmem:[#allocation2 + $0x50] sm:$0xff]  ;;  %v827_v38 = vld [vmem:[#allocation2 + $0x68] sm:$0xff] }
 0x223   : > { %839 = vst [vmem:[%s1872_s9 + $0x8] sm:$0xff] %v823_v34  ;;  %v828_v39 = vld [vmem:[#allocation2 + $0x8] sm:$0xff]  ;;  %v830_v41 = vld [vmem:[#allocation2 + $0x40] sm:$0xff]  ;;  %v832_v42 = vld [vmem:[#allocation2 + $0x10] sm:$0xff] }
 0x224   : > { %840 = vst [vmem:[%s1872_s9 + $0x10] sm:$0xff] %v824_v35  ;;  %v829_v40 = vld [vmem:[#allocation2 + $0x48] sm:$0xff]  ;;  %v831_v33 = vld [vmem:[#allocation2 + $0x20] sm:$0xff]  ;;  %v833_v43 = vld [vmem:[#allocation2 + $0x38] sm:$0xff] }
 0x225   : > { %841 = vst [vmem:[%s1872_s9 + $0x18] sm:$0xff] %v825_v36  ;;  %v834_v44 = vld [vmem:[#allocation2 + $0x60] sm:$0xff]  ;;  %v835_v45 = vld [vmem:[#allocation2 + $0x70] sm:$0xff]  ;;  %v836_v46 = vld [vmem:[#allocation2 + $0x78] sm:$0xff] }
 0x226   : > { %842 = vst [vmem:[%s1872_s9 + $0x20] sm:$0xff] %v826_v37  ;;  %v837_v48 = vld [vmem:[#allocation2 + $0x28] sm:$0xff] }
 0x227   : > { %843 = vst [vmem:[%s1872_s9 + $0x28] sm:$0xff] %v827_v38 }
 0x228   : > { %844 = vst [vmem:[%s1872_s9 + $0x30] sm:$0xff] %v828_v39 }
 0x229   : > { %845 = vst [vmem:[%s1872_s9 + $0x38] sm:$0xff] %v829_v40 }
 0x22a   : > { %846 = vst [vmem:[%s1872_s9 + $0x40] sm:$0xff] %v830_v41 }
 0x22b   : > { %847 = vst [vmem:[%s1872_s9 + $0x48] sm:$0xff] %v831_v33 }
 0x22c   : > { %848 = vst [vmem:[%s1872_s9 + $0x50] sm:$0xff] %v832_v42 }
 0x22d   : > { %849 = vst [vmem:[%s1872_s9 + $0x58] sm:$0xff] %v833_v43 }
 0x22e   : > { %850 = vst [vmem:[%s1872_s9 + $0x60] sm:$0xff] %v834_v44 }
 0x22f   : > { %851 = vst [vmem:[%s1872_s9 + $0x68] sm:$0xff] %v835_v45 }
 0x230   : > { %852 = vst [vmem:[%s1872_s9 + $0x70] sm:$0xff] %v836_v46 }
 0x231   : > { %853 = vst [vmem:[%s1872_s9 + $0x78] sm:$0xff] %v837_v48 }
 0x232 PF: > { %s855_s18 = scalar_lea.sflag [#allocation5], %s1666_s0  ;;  %861 = sbr.rel (!%p1593_p4) target bundleno = 604 (0x25c), region = 60 }
 0x233   : > { %s2018_s28 = sld [smem:[#allocation16_spill]] (%p1593_p4) }
 0x239   : > { %s1035_s15 = sshll.u32 %s2018_s28, 3 }
 0x23a   : > { %s863_s25 = ssub.s32 18, %s1035_s15 }
 0x23b   : > { %p864_p5 = scmp.lt.s32.totalorder %s863_s25, 8 }
 0x23d   : > { %s2045_s25 = smov (!%p864_p5, %s863_s25), 8 }
 0x23e   : > { %s1051_s29 = sshll.u32 %s2045_s25, 4 }
 0x23f   : > { %s868_s12 = ssub.s32 128, %s1051_s29 }
 0x240   : > { %s869_s17 = sshll.u32 %s868_s12, 4 }
 0x241   : > { %870 = vsyncadd %s855_s18, %s869_s17  ;;  %p1908_p8 = scmp.ne.s32.totalorder %s1051_s29, 0  ;;  %s1053_s5 = sshll.u32 %s2018_s28, 7 }
 0x242   : > { %s2020_s11 = sld [smem:[#allocation24_spill]]  ;;  %s876_s3 = sshll.u32 %s1872_s9, 4  ;;  %s1917_s3 = int_to_ptr.vmem [resolvable:$true] %s876_s3 }
 0x243   : > { %s1042_s19 = sshll.u32 %s2045_s25, 8  ;;  %s1303_s21 = sshra.s32 %s1917_s3, 4  ;;  %s1304_s21 = int_to_ptr.vmem [resolvable:$true] %s1303_s21 }
 0x244   : > { %s1305_s8 = sshrl.u32 %s1042_s19, 4  ;;  %s1448_s26 = smov [#allocation9]  }
 0x245   : > { %s1310_s30 = scalar_lea.vmem %s1304_s21, %s1305_s8  ;;  %s1314_s27 = scalar_lea.vmem %s1448_s26, 256 }
 0x246   : > { %p1311_p4 = scmp.ne.s32.totalorder %s1304_s21, %s1310_s30  ;;  %p1316_p6 = scmp.lt.s32.totalorder %s1314_s27, %s1310_s30 }
 0x248   : > { %s874_s7 = scalar_lea.hbm %s2020_s11, %s1053_s5  ;;  %p1312_p2 = pnand %p1311_p4, %p1908_p8 }
 0x249   : > { %s878_s14 = sshll.u32 %s874_s7, 4  ;;  %s1919_s14 = int_to_ptr.hbm [resolvable:$true] %s878_s14 }
 0x24a   : > { %p1313_p1 = pneg %p1312_p2 }
 0x24c   : > { %p1318_p9 = pnand %p1316_p6, %p1313_p1 }
 0x24e   : > { %1321 = shalt.err (!%p1318_p9)
}
 0x24f   : > { %s1322_s23 = sshra.s32 %s1919_s14, 4  ;;  %s1333_s15 = scalar_lea.hbm %s2020_s11, 288  ;;  %s1323_s23 = int_to_ptr.hbm [resolvable:$true] %s1322_s23 }
 0x250   : > { %s1329_s4 = scalar_lea.hbm %s1323_s23, %s1305_s8  ;;  %p1334_p7 = scmp.lt.s32.totalorder %s1323_s23, %s2020_s11 }
 0x251   : > { %p1330_p3 = scmp.ne.s32.totalorder %s1323_s23, %s1329_s4  ;;  %p1335_p12 = scmp.lt.s32.totalorder %s1333_s15, %s1329_s4 }
 0x253   : > { %p1331_p11 = pnand %p1330_p3, %p1908_p8  ;;  %p1336_p13 = por %p1335_p12, %p1334_p7 }
 0x255   : > { %p1332_p0 = pneg %p1331_p11 }
 0x257   : > { %p1337_p5 = pnand %p1336_p13, %p1332_p0 }
 0x259   : > { %1340 = shalt.err (!%p1337_p5)
}
 0x25a   : > { %s1449_s17 = smov 256   ;;  %s1450_s5 = smov 16  }
 0x25b   : > { %884 = dma.vmem_to_hbm [thread:$0]  (%p1908_p8), %s1917_s3, %s1042_s19, %s1919_s14, %s855_s18, %s1449_s17, %s1449_s17, %s1450_s5  }
 0x25c PF: > { %s2021_s6 = sld [smem:[#allocation14_spill]]  ;;  %p1096_p4 = scmp.ge.s32.totalorder %s1440_s22, 2 }
 0x25e   : > { %p1093_p2 = pnand %p1096_p4, %p1600_p10 }
 0x260   : > { %p1094_p1 = pneg %p1093_p2 }
 0x262   : > { %s893_s7 = sand.u32 1, %s2021_s6  }
 0x263   : > { %s894_s21 = scalar_lea.sflag [#allocation5], %s893_s7 }
 0x264   : > { %1395 = dma.done.wait (%p1094_p1), %s894_s21, 2048  }
 0x265   : > { %1397 = vsyncadd (%p1094_p1), %s894_s21, 4294965248  ;;  %s22_s22 = sadd.s32 1, %s1440_s22   ;;  %s2023_s0 = sld [smem:[#allocation13_spill]] }
 0x266   : > { %p19_p6 = scmp.ge.s32.totalorder %s22_s22, 14   ;;  %s2024_s14 = sld [smem:[#allocation20_spill]] }
 0x267   : > { %s2025_s18 = sld [smem:[#allocation15_spill]]  ;;  %s2030_s12 = smov %s1404_s13 }
 0x268   : > { %s2026_s17 = sld [smem:[#allocation21_spill]]  ;;  %s2032_s15 = smov %s1416_s16 }
 0x269   : > { %s2027_s19 = sld [smem:[#allocation17_spill]] }
 0x26a   : > { %s2028_s25 = sld [smem:[#allocation18_spill]] }
 0x26b   : > { %s2029_s21 = sld [smem:[#allocation19_spill]]  ;;  %s2031_s13 = smov %s2023_s0 }
 0x26c   :  { %21 = sbr.rel (!%p19_p6) target bundleno = 14 (0xe), region = 113 }
 0x26d   : > { %s2033_s16 = smov %s2025_s18  ;;  %s2034_s18 = smov %s1432_s20 }
 0x270   : > { %s2035_s20 = smov %s2028_s25 }
 0x271   :  { %900 = vsyncpa [#allocation4], 1 }
 0x272   :  { %902 = vsyncpa [#allocation4 + $0x1], 1 }
 0x273   :  { %903 = vsyncpa [#allocation7], 1 }
 0x274   :  { %905 = vsyncpa [#allocation7 + $0x1], 1 }
 0x275   :  { %906 = vsyncpa [#allocation5], 1 }
 0x276   :  { %908 = vsyncpa [#allocation5 + $0x1], 1 }

</bundles_post_ra>
